<compile_context>
chip_gen: v5e
topology: v5e:2x2
jax: 0.10.0
libtpu: 0.0.40
codegen_flags: <defaults>
</compile_context>

<pallas_src>
import jax
import jax.numpy as jnp
from jax.experimental import pallas as pl
from jax.experimental.pallas import tpu as pltpu

_LANE = 128
_TARGET_STREAM_BYTES = 4 * 1024 * 1024  # per-grid-step streamed-bytes target


def _cast(v, dt):
    return v if v.dtype == dt else v.astype(dt)


def _ffnn_kernel(x_ref,
                 w1_ref, b1_ref,
                 w2_ref, b2_ref,
                 w3_ref, b3_ref,
                 w4_ref, b4_ref,
                 o_ref):
    # Fused MLP on one batch tile, feature-major: activations are
    # (features, tile_b) so batch is on the lane axis.  Matmuls on the MXU
    # (f32 accumulation), bias-add + ReLU on the VPU in f32.
    cdt = w1_ref.dtype  # matmul operand dtype (f32 or bf16)

    h = jnp.dot(w1_ref[...], _cast(x_ref[...], cdt),
                preferred_element_type=jnp.float32) + b1_ref[...]
    h = jnp.maximum(h, 0.0)

    h = jnp.dot(w2_ref[...], _cast(h, cdt),
                preferred_element_type=jnp.float32) + b2_ref[...]
    h = jnp.maximum(h, 0.0)

    h = jnp.dot(w3_ref[...], _cast(h, cdt),
                preferred_element_type=jnp.float32) + b3_ref[...]
    h = jnp.maximum(h, 0.0)

    out = jnp.dot(w4_ref[...], _cast(h, cdt),
                  preferred_element_type=jnp.float32) + b4_ref[...]
    o_ref[...] = out.astype(o_ref.dtype)


def _resident_spec(shape):
    # Full-array block, constant block index -> stays resident in VMEM across
    # the batch grid.  Rank captured per-operand (no late-binding closure bug).
    ndim = len(shape)
    return pl.BlockSpec(shape, lambda i, _n=ndim: (0,) * _n)


def _vmem_limit_bytes(streamed_tile_bytes, resident_bytes, scratch_bytes):
    # Computed VMEM budget: double-buffered streamed tiles + (double-buffered)
    # resident params + intermediate headroom + slack, capped at 75% of
    # physical VMEM (64 MiB conservative fallback covers v7x; v5e/v6e = 128).
    phys = 64 * 1024 * 1024
    try:
        info = pltpu.get_tpu_info()
        phys = int(getattr(info, "vmem_capacity_bytes", phys))
    except Exception:
        pass
    cap = (phys * 3) // 4
    needed = 2 * streamed_tile_bytes + 2 * resident_bytes + scratch_bytes + (4 << 20)
    return int(min(max(needed, 32 * 1024 * 1024), cap))


def ffnn_forward(x, params, *, tile_b=None):
    """x: (B, input_dim) f32.
    params: w1..w4 shaped (out_features, in_features) [f32 or bf16] (PyTorch
    nn.Linear layout) and b1..b4 shaped (out_features, 1) in f32.
    Returns (B, output_dim) f32 logits."""
    B, in_dim = x.shape
    hidden_dim = params["w1"].shape[0]
    out_dim = params["w4"].shape[0]
    assert params["w1"].shape[1] == in_dim

    # ---- Feature-major: put the large batch axis on the 128-lane axis. ----
    x_fm = x.T  # (in_dim, B)

    # ---- Tile size from actual streamed bytes (x in + out out), 128-aligned.
    bytes_per_col = in_dim * x.dtype.itemsize + out_dim * 4
    if tile_b is None:
        tile_b = _TARGET_STREAM_BYTES // max(bytes_per_col, 1)
    b_rounded = pl.cdiv(B, _LANE) * _LANE
    tile_b = int(min(max(int(tile_b), _LANE), 2048, b_rounded))
    tile_b = max(_LANE, (tile_b // _LANE) * _LANE)
    B_pad = pl.cdiv(B, tile_b) * tile_b
    if B_pad != B:
        x_fm = jnp.pad(x_fm, ((0, 0), (0, B_pad - B)))
    grid = (B_pad // tile_b,)

    args = (x_fm,
            params["w1"], params["b1"],
            params["w2"], params["b2"],
            params["w3"], params["b3"],
            params["w4"], params["b4"])

    in_specs = [pl.BlockSpec((in_dim, tile_b), lambda i: (0, i))]   # streamed x
    in_specs += [_resident_spec(a.shape) for a in args[1:]]         # resident W/b
    # Lane-dense output block; no column padding, no post-slice HBM pass.
    out_spec = pl.BlockSpec((out_dim, tile_b), lambda i: (0, i))

    resident_bytes = sum(int(a.size) * a.dtype.itemsize for a in args[1:])
    streamed_tile_bytes = tile_b * bytes_per_col
    scratch_bytes = 2 * hidden_dim * tile_b * 4  # f32 intermediates headroom

    out_fm = pl.pallas_call(
        _ffnn_kernel,
        out_shape=jax.ShapeDtypeStruct((out_dim, B_pad), jnp.float32),
        grid=grid,
        in_specs=in_specs,
        out_specs=out_spec,
        compiler_params=pltpu.CompilerParams(
            dimension_semantics=("parallel",),
            vmem_limit_bytes=_vmem_limit_bytes(
                streamed_tile_bytes, resident_bytes, scratch_bytes),
        ),
    )(*args)

    return out_fm[:, :B].T  # back to (B, out_dim)


def init_params(key, input_dim, hidden_dim, output_dim, weight_dtype=jnp.float32):
    """Deterministic init mimicking PyTorch nn.Linear (uniform +-1/sqrt(fan_in)).
    Weights keep the PyTorch (out_features, in_features) layout; biases are
    (out_features, 1) f32 (elementwise math stays f32 in the kernel)."""
    dims = [(hidden_dim, input_dim),
            (hidden_dim, hidden_dim),
            (hidden_dim, hidden_dim),
            (output_dim, hidden_dim)]
    params = {}
    for i, (fan_out, fan_in) in enumerate(dims, start=1):
        key, kw, kb = jax.random.split(key, 3)
        bound = 1.0 / float(fan_in) ** 0.5
        params[f"w{i}"] = jax.random.uniform(
            kw, (fan_out, fan_in), jnp.float32, -bound, bound).astype(weight_dtype)
        params[f"b{i}"] = jax.random.uniform(
            kb, (fan_out, 1), jnp.float32, -bound, bound)
    return params


def ffnn_reference(x, params):
    """Pure-JAX reference with identical cast/accumulation semantics."""
    h = x
    for i in range(1, 5):
        w = params[f"w{i}"]                       # (out, in)
        b = params[f"b{i}"][:, 0].astype(jnp.float32)
        h = jnp.dot(h.astype(w.dtype), w.T, preferred_element_type=jnp.float32) + b
        if i < 4:
            h = jnp.maximum(h, 0.0)
    return h


if __name__ == "__main__":
    # Apple-quality-style MLP: small feature vector in, small class logits out.
    batch, input_dim, hidden_dim, output_dim = 8, 8, 32, 4

    key = jax.random.PRNGKey(0)
    key, kx = jax.random.split(key)
    x = jax.random.normal(kx, (batch, input_dim), jnp.float32)
    params = init_params(key, input_dim, hidden_dim, output_dim)

    # 1) f32 weights: tight check vs JAX reference.
    out = jax.block_until_ready(ffnn_forward(x, params))
    ref = ffnn_reference(x, params)
    assert out.shape == (batch, output_dim)
    assert bool(jnp.allclose(out, ref, atol=1e-4, rtol=1e-4)), "f32 mismatch"

    # 2) bf16 weights (MXU-native on v6e/v7x), f32 accumulation / bias / ReLU.
    params_bf16 = {k: (v.astype(jnp.bfloat16) if k.startswith("w") else v)
                   for k, v in params.items()}
    out_bf = jax.block_until_ready(ffnn_forward(x, params_bf16))
    ref_bf = ffnn_reference(x, params_bf16)
    assert bool(jnp.allclose(out_bf, ref_bf, atol=1e-2, rtol=1e-2)), "bf16 mismatch"

    # 3) Larger, non-multiple batch: exercises batch tiling (grid > 1), batch
    #    padding on the lane axis, resident weights, and the parallel axis.
    xb = jax.random.normal(jax.random.PRNGKey(1), (600, input_dim), jnp.float32)
    out_big = jax.block_until_ready(ffnn_forward(xb, params, tile_b=256))
    ref_big = ffnn_reference(xb, params)
    assert out_big.shape == (600, output_dim)
    assert bool(jnp.allclose(out_big, ref_big, atol=1e-4, rtol=1e-4)), "big-batch mismatch"

    print("KERNEL_OK")
</pallas_src>

<mosaic_0001>
module attributes {stable_mosaic.version = 11 : i64} {
  func.func @_ffnn_kernel(%arg0: i32, %arg1: memref<8x128xf32, #tpu.memory_space<vmem>>, %arg2: memref<32x8xf32, #tpu.memory_space<vmem>>, %arg3: memref<32x1xf32, #tpu.memory_space<vmem>>, %arg4: memref<32x32xf32, #tpu.memory_space<vmem>>, %arg5: memref<32x1xf32, #tpu.memory_space<vmem>>, %arg6: memref<32x32xf32, #tpu.memory_space<vmem>>, %arg7: memref<32x1xf32, #tpu.memory_space<vmem>>, %arg8: memref<4x32xf32, #tpu.memory_space<vmem>>, %arg9: memref<4x1xf32, #tpu.memory_space<vmem>>, %arg10: memref<4x128xf32, #tpu.memory_space<vmem>>) attributes {dimension_semantics = [#tpu.dimension_semantics<parallel>], iteration_bounds = array<i64: 1>, scalar_prefetch = 0 : i64, scratch_operands = 0 : i64, tpu.core_type = #tpu.core_type<tc>, window_params = [{transform_indices = @transform_0, window_bounds = array<i64: 8, 128>}, {pipeline_mode = #tpu.pipeline_mode<synchronous>, transform_indices = @transform_1, window_bounds = array<i64: 32, 8>}, {pipeline_mode = #tpu.pipeline_mode<synchronous>, transform_indices = @transform_2, window_bounds = array<i64: 32, 1>}, {pipeline_mode = #tpu.pipeline_mode<synchronous>, transform_indices = @transform_3, window_bounds = array<i64: 32, 32>}, {pipeline_mode = #tpu.pipeline_mode<synchronous>, transform_indices = @transform_4, window_bounds = array<i64: 32, 1>}, {pipeline_mode = #tpu.pipeline_mode<synchronous>, transform_indices = @transform_5, window_bounds = array<i64: 32, 32>}, {pipeline_mode = #tpu.pipeline_mode<synchronous>, transform_indices = @transform_6, window_bounds = array<i64: 32, 1>}, {pipeline_mode = #tpu.pipeline_mode<synchronous>, transform_indices = @transform_7, window_bounds = array<i64: 4, 32>}, {pipeline_mode = #tpu.pipeline_mode<synchronous>, transform_indices = @transform_8, window_bounds = array<i64: 4, 1>}, {transform_indices = @transform_9, window_bounds = array<i64: 4, 128>}]} {
    %c0 = arith.constant 0 : index
    %c0_0 = arith.constant 0 : index
    %0 = vector.load %arg2[%c0, %c0_0] : memref<32x8xf32, #tpu.memory_space<vmem>>, vector<32x8xf32>
    %c0_1 = arith.constant 0 : index
    %c0_2 = arith.constant 0 : index
    %1 = vector.load %arg1[%c0_1, %c0_2] : memref<8x128xf32, #tpu.memory_space<vmem>>, vector<8x128xf32>
    %cst = arith.constant dense<0.000000e+00> : vector<32x128xf32>
    %2 = tpu.matmul %0, %1, %cst {dimension_numbers = #tpu.dot_dimension_numbers<[1], [0], [0], [1], [0, 0, 1, 1], [], []>} : vector<32x8xf32>, vector<8x128xf32>, vector<32x128xf32> -> vector<32x128xf32>
    %c0_3 = arith.constant 0 : index
    %c0_4 = arith.constant 0 : index
    %3 = vector.load %arg3[%c0_3, %c0_4] : memref<32x1xf32, #tpu.memory_space<vmem>>, vector<32x1xf32>
    %4 = vector.broadcast %3 : vector<32x1xf32> to vector<32x128xf32>
    %5 = arith.addf %2, %4 : vector<32x128xf32>
    %cst_5 = arith.constant 0.000000e+00 : f32
    %6 = vector.broadcast %cst_5 : f32 to vector<32x128xf32>
    %7 = arith.maximumf %5, %6 : vector<32x128xf32>
    %c0_6 = arith.constant 0 : index
    %c0_7 = arith.constant 0 : index
    %8 = vector.load %arg4[%c0_6, %c0_7] : memref<32x32xf32, #tpu.memory_space<vmem>>, vector<32x32xf32>
    %cst_8 = arith.constant dense<0.000000e+00> : vector<32x128xf32>
    %9 = tpu.matmul %8, %7, %cst_8 {dimension_numbers = #tpu.dot_dimension_numbers<[1], [0], [0], [1], [0, 0, 1, 1], [], []>} : vector<32x32xf32>, vector<32x128xf32>, vector<32x128xf32> -> vector<32x128xf32>
    %c0_9 = arith.constant 0 : index
    %c0_10 = arith.constant 0 : index
    %10 = vector.load %arg5[%c0_9, %c0_10] : memref<32x1xf32, #tpu.memory_space<vmem>>, vector<32x1xf32>
    %11 = vector.broadcast %10 : vector<32x1xf32> to vector<32x128xf32>
    %12 = arith.addf %9, %11 : vector<32x128xf32>
    %cst_11 = arith.constant 0.000000e+00 : f32
    %13 = vector.broadcast %cst_11 : f32 to vector<32x128xf32>
    %14 = arith.maximumf %12, %13 : vector<32x128xf32>
    %c0_12 = arith.constant 0 : index
    %c0_13 = arith.constant 0 : index
    %15 = vector.load %arg6[%c0_12, %c0_13] : memref<32x32xf32, #tpu.memory_space<vmem>>, vector<32x32xf32>
    %cst_14 = arith.constant dense<0.000000e+00> : vector<32x128xf32>
    %16 = tpu.matmul %15, %14, %cst_14 {dimension_numbers = #tpu.dot_dimension_numbers<[1], [0], [0], [1], [0, 0, 1, 1], [], []>} : vector<32x32xf32>, vector<32x128xf32>, vector<32x128xf32> -> vector<32x128xf32>
    %c0_15 = arith.constant 0 : index
    %c0_16 = arith.constant 0 : index
    %17 = vector.load %arg7[%c0_15, %c0_16] : memref<32x1xf32, #tpu.memory_space<vmem>>, vector<32x1xf32>
    %18 = vector.broadcast %17 : vector<32x1xf32> to vector<32x128xf32>
    %19 = arith.addf %16, %18 : vector<32x128xf32>
    %cst_17 = arith.constant 0.000000e+00 : f32
    %20 = vector.broadcast %cst_17 : f32 to vector<32x128xf32>
    %21 = arith.maximumf %19, %20 : vector<32x128xf32>
    %c0_18 = arith.constant 0 : index
    %c0_19 = arith.constant 0 : index
    %22 = vector.load %arg8[%c0_18, %c0_19] : memref<4x32xf32, #tpu.memory_space<vmem>>, vector<4x32xf32>
    %cst_20 = arith.constant dense<0.000000e+00> : vector<4x128xf32>
    %23 = tpu.matmul %22, %21, %cst_20 {dimension_numbers = #tpu.dot_dimension_numbers<[1], [0], [0], [1], [0, 0, 1, 1], [], []>} : vector<4x32xf32>, vector<32x128xf32>, vector<4x128xf32> -> vector<4x128xf32>
    %c0_21 = arith.constant 0 : index
    %c0_22 = arith.constant 0 : index
    %24 = vector.load %arg9[%c0_21, %c0_22] : memref<4x1xf32, #tpu.memory_space<vmem>>, vector<4x1xf32>
    %25 = vector.broadcast %24 : vector<4x1xf32> to vector<4x128xf32>
    %26 = arith.addf %23, %25 : vector<4x128xf32>
    %c0_23 = arith.constant 0 : index
    %c0_24 = arith.constant 0 : index
    %27 = vector.load %arg10[%c0_23, %c0_24] : memref<4x128xf32, #tpu.memory_space<vmem>>, vector<4x128xf32>
    tpu.vector_store %arg10[%c0_23, %c0_24], %26 {strides = array<i32>} : memref<4x128xf32, #tpu.memory_space<vmem>>, vector<4x128xf32>,
    return
  }
  func.func @transform_0(%arg0: i32) -> (i32, i32) {
    %c0_i32 = arith.constant 0 : i32
    %c0_i32_0 = arith.constant 0 : i32
    return %c0_i32, %arg0 : i32, i32
  }
  func.func @transform_1(%arg0: i32) -> (i32, i32) {
    %c0_i32 = arith.constant 0 : i32
    %c0_i32_0 = arith.constant 0 : i32
    %c0_i32_1 = arith.constant 0 : i32
    return %c0_i32, %c0_i32_0 : i32, i32
  }
  func.func @transform_2(%arg0: i32) -> (i32, i32) {
    %c0_i32 = arith.constant 0 : i32
    %c0_i32_0 = arith.constant 0 : i32
    %c0_i32_1 = arith.constant 0 : i32
    return %c0_i32, %c0_i32_0 : i32, i32
  }
  func.func @transform_3(%arg0: i32) -> (i32, i32) {
    %c0_i32 = arith.constant 0 : i32
    %c0_i32_0 = arith.constant 0 : i32
    %c0_i32_1 = arith.constant 0 : i32
    return %c0_i32, %c0_i32_0 : i32, i32
  }
  func.func @transform_4(%arg0: i32) -> (i32, i32) {
    %c0_i32 = arith.constant 0 : i32
    %c0_i32_0 = arith.constant 0 : i32
    %c0_i32_1 = arith.constant 0 : i32
    return %c0_i32, %c0_i32_0 : i32, i32
  }
  func.func @transform_5(%arg0: i32) -> (i32, i32) {
    %c0_i32 = arith.constant 0 : i32
    %c0_i32_0 = arith.constant 0 : i32
    %c0_i32_1 = arith.constant 0 : i32
    return %c0_i32, %c0_i32_0 : i32, i32
  }
  func.func @transform_6(%arg0: i32) -> (i32, i32) {
    %c0_i32 = arith.constant 0 : i32
    %c0_i32_0 = arith.constant 0 : i32
    %c0_i32_1 = arith.constant 0 : i32
    return %c0_i32, %c0_i32_0 : i32, i32
  }
  func.func @transform_7(%arg0: i32) -> (i32, i32) {
    %c0_i32 = arith.constant 0 : i32
    %c0_i32_0 = arith.constant 0 : i32
    %c0_i32_1 = arith.constant 0 : i32
    return %c0_i32, %c0_i32_0 : i32, i32
  }
  func.func @transform_8(%arg0: i32) -> (i32, i32) {
    %c0_i32 = arith.constant 0 : i32
    %c0_i32_0 = arith.constant 0 : i32
    %c0_i32_1 = arith.constant 0 : i32
    return %c0_i32, %c0_i32_0 : i32, i32
  }
  func.func @transform_9(%arg0: i32) -> (i32, i32) {
    %c0_i32 = arith.constant 0 : i32
    %c0_i32_0 = arith.constant 0 : i32
    return %c0_i32, %arg0 : i32, i32
  }
}

</mosaic_0001>

<bundles_post_ra>
// kernel: tpu_custom_call.1
= control target key start
LH: loop header
LB: loop body
LE: loop exit
PB: predicated region body
PF: predicated region fallthrough
CT: control target
= control target key end

     0   :  { %vm62_vm0 = vcmask 64512   ;;  %v354_v3 = vmov 0   ;;  %s503_s0 = inlined_call_operand.vmem [shape: f32[8,128], index: 0, kind: input, shape index: {}]   ;;  %s504_s1 = inlined_call_operand.vmem [shape: f32[32,8], index: 1, kind: input, shape index: {}]   ;;  %s505_s2 = inlined_call_operand.vmem [shape: f32[32,1], index: 2, kind: input, shape index: {}]   ;;  %s506_s3 = inlined_call_operand.vmem [shape: f32[32,32], index: 3, kind: input, shape index: {}]   ;;  %s507_s4 = inlined_call_operand.vmem [shape: f32[32,1], index: 4, kind: input, shape index: {}]   ;;  %s508_s5 = inlined_call_operand.vmem [shape: f32[32,32], index: 5, kind: input, shape index: {}]   ;;  %s509_s6 = inlined_call_operand.vmem [shape: f32[32,1], index: 6, kind: input, shape index: {}]   ;;  %s510_s7 = inlined_call_operand.vmem [shape: f32[4,32], index: 7, kind: input, shape index: {}]   ;;  %s511_s8 = inlined_call_operand.vmem [shape: f32[4,1], index: 8, kind: input, shape index: {}]   ;;  %s512_s9 = inlined_call_operand.hbm [shape: f32[4,128], index: 9, kind: output, shape index: {}]  }
   0x1   :  { %v37_v0 = vld [vmem:[%s503_s0] sm:$0xff]  ;;  %v41_v1 = vld [vmem:[%s505_s2 + $0x18] sm:$0xff]  ;;  %325 = vset.pattern.permute.xlu0 %v354_v3  ;;  %v39_v4 = vld [vmem:[%s505_s2 + $0x8] sm:$0xff]  ;;  %326 = vset.pattern.permute.xlu1 %v354_v3 }
   0x2   :  { %v33_v2 = vld [vmem:[%s504_s1] sm:$0xff]  ;;  %90 = vmatpush.msra.mxu0 %v37_v0  ;;  %59 = vperm.xlu0 %325, %v41_v1  }
   0x3   :  { %302 = vmatmul.msk.f32.vlgmr.msra.gmra.mxu0 %vm62_vm0, %v33_v2  ;;  %327 = vset.pattern.permute.xlu2 %v354_v3 }
   0x4   :  { %49 = vperm.xlu1 %326, %v39_v4  }
   0x5   :  { %14 = vsyncpa [#allocation3], 0  ;;  %v40_v5 = vld [vmem:[%s505_s2 + $0x10] sm:$0xff]  ;;  %v34_v6 = vld [vmem:[%s504_s1 + $0x8] sm:$0xff]  ;;  %vm136_vm1 = vcmask 261120   ;;  %s355_s11 = smov [#allocation2]  }
   0x6   :  { %v38_v7 = vld [vmem:[%s505_s2] sm:$0xff]  ;;  %v113_v8 = vld [vmem:[%s507_s4 + $0x8] sm:$0xff]  ;;  %v35_v9 = vld [vmem:[%s504_s1 + $0x10] sm:$0xff]  ;;  %s291_s12 = sshll.u32 %s355_s11, 4  ;;  %s292_s12 = int_to_ptr.vmem [resolvable:$true] %s291_s12 }
   0x7   :  { %v112_v10 = vld [vmem:[%s507_s4] sm:$0xff]  ;;  %v188_v11 = vld [vmem:[%s509_s6 + $0x10] sm:$0xff]  ;;  %v36_v12 = vld [vmem:[%s504_s1 + $0x18] sm:$0xff]  ;;  %s293_s1 = sshll.u32 %s512_s9, 4  ;;  %s294_s1 = int_to_ptr.hbm [resolvable:$true] %s293_s1 }
   0x8   :  { %v187_v13 = vld [vmem:[%s509_s6 + $0x8] sm:$0xff]  ;;  %v256_v14 = vld [vmem:[%s511_s8] sm:$0xf]  ;;  %v115_v20 = vld [vmem:[%s507_s4 + $0x18] sm:$0xff] }
   0x9   :  { %133 = vperm.xlu2 %327, %v115_v20   ;;  %v114_v28 = vld [vmem:[%s507_s4 + $0x10] sm:$0xff]  ;;  %v108_v33 = vld [vmem:[%s506_s3] sm:$0xff]  ;;  %v111_v34 = vld [vmem:[%s506_s3 + $0x18] sm:$0xff] }
   0xa   :  { %54 = vperm.xlu0 %325, %v40_v5   ;;  %v189_v35 = vld [vmem:[%s509_s6 + $0x18] sm:$0xff]  ;;  %v109_v36 = vld [vmem:[%s506_s3 + $0x8] sm:$0xff]  ;;  %v186_v37 = vld [vmem:[%s509_s6] sm:$0xff] }
   0xb   :  { %303 = vmatmul.msk.f32.gmra.mxu0 %vm62_vm0, %v34_v6  ;;  %v110_v38 = vld [vmem:[%s506_s3 + $0x10] sm:$0xff]  ;;  %v182_v55 = vld [vmem:[%s508_s5] sm:$0xff]  ;;  %v185_v56 = vld [vmem:[%s508_s5 + $0x18] sm:$0xff] }
   0xc   :  { %44 = vperm.xlu1 %326, %v38_v7   ;;  %v183_v57 = vld [vmem:[%s508_s5 + $0x8] sm:$0xff]  ;;  %v184_v58 = vld [vmem:[%s508_s5 + $0x10] sm:$0xff] }
  0x11   :  { %128 = vperm.xlu2 %327, %v114_v28  }
  0x12   :  { %123 = vperm.xlu0 %325, %v113_v8  }
  0x13   :  { %304 = vmatmul.msk.f32.gmra.mxu0 %vm62_vm0, %v35_v9 }
  0x14   :  { %118 = vperm.xlu1 %326, %v112_v10  }
  0x19   :  { %207 = vperm.xlu2 %327, %v189_v35  }
  0x1a   :  { %202 = vperm.xlu0 %325, %v188_v11   ;;  %v255_v11 = vld [vmem:[%s510_s7] sm:$0xf] }
  0x1b   :  { %305 = vmatmul.msk.f32.gmra.mxu0 %vm62_vm0, %v36_v12 }
  0x1c   :  { %197 = vperm.xlu1 %326, %v187_v13  }
  0x21   :  { %192 = vperm.xlu2 %327, %v186_v37  }
  0x22   :  { %259 = vperm.xlu0 %325, %v256_v14  }
  0x63   :  { %v134_v40 = vpop.permute.xlu2 %133 }
  0x6b   :  { %v129_v46 = vpop.permute.xlu2 %128 }
  0x73   :  { %v208_v59 = vpop.permute.xlu2 %207 }
  0x74   :  { %v60_v17 = vpop.permute.xlu0 %59 }
  0x76   :  { %v50_v18 = vpop.permute.xlu1 %49 }
  0x7b   :  { %v193_v6 = vpop.permute.xlu2 %192 }
  0x7c   :  { %v55_v21 = vpop.permute.xlu0 %54 }
  0x7e   :  { %v45_v25 = vpop.permute.xlu1 %44 }
  0x80   :  { %v92_v15 = vpop.f32.mrf.mxu0 }
  0x81   :  { %v93_v29 = vadd.f32 %v92_v15, %v45_v25 }
  0x83   :  { %v104_v32 = vmax.f32 %v93_v29, 0.0 }
  0x84   :  { %v124_v45 = vpop.permute.xlu0 %123 }
  0x86   :  { %v119_v50 = vpop.permute.xlu1 %118 }
  0x88   :  { %v95_v16 = vpop.f32.mrf.mxu0 }
  0x89   :  { %v96_v26 = vadd.f32 %v95_v16, %v50_v18 }
  0x8b   :  { %v105_v31 = vmax.f32 %v96_v26, 0.0 }
  0x8c   :  { %v203_v1 = vpop.permute.xlu0 %202 }
  0x8e   :  { %v198_v2 = vpop.permute.xlu1 %197 }
  0x90   :  { %v98_v19 = vpop.f32.mrf.mxu0 }
  0x91   :  { %v99_v23 = vadd.f32 %v98_v19, %v55_v21 }
  0x93   :  { %v106_v30 = vmax.f32 %v99_v23, 0.0 }
  0x94   :  { %v260_v12 = vpop.permute.xlu0 %259 }
  0x98   :  { %v101_v22 = vpop.f32.mrf.mxu0 }
  0x99   :  { %v102_v24 = vadd.f32 %v101_v22, %v60_v17 }
  0x9b   :  { %v107_v27 = vmax.f32 %v102_v24, 0.0 }
  0x9d   :  { %161 = vmatpush.msra.mxu1 %v107_v27  ;;  %315 = vmatpush.msra.mxu3 %v107_v27 }
  0x9f   :  { %162 = vmatpush.msra.mxu1 %v106_v30  ;;  %316 = vmatpush.msra.mxu3 %v106_v30 }
  0xa1   :  { %163 = vmatpush.msra.mxu1 %v105_v31  ;;  %317 = vmatpush.msra.mxu3 %v105_v31 }
  0xa3   :  { %164 = vmatpush.msra.mxu1 %v104_v32  ;;  %318 = vmatpush.msra.mxu3 %v104_v32 }
  0xa4   :  { %306 = vmatmul.msk.f32.vlgmr.msra.gmra.mxu1 %vm136_vm1, %v108_v33  ;;  %309 = vmatmul.msk.f32.vlgmr.msra.gmra.mxu3 %vm136_vm1, %v111_v34 }
  0xac   :  { %307 = vmatmul.msk.f32.gmra.mxu1 %vm136_vm1, %v109_v36 }
  0xb4   :  { %308 = vmatmul.msk.f32.gmra.mxu1 %vm136_vm1, %v110_v38 }
 0x121   :  { %v166_v39 = vpop.f32.mrf.mxu1 }
 0x122   :  { %v167_v51 = vadd.f32 %v166_v39, %v119_v50 }
 0x124   :  { %v178_v54 = vmax.f32 %v167_v51, 0.0 }
 0x127   :  { %v175_v41 = vpop.f32.mrf.mxu3 }
 0x128   :  { %v176_v42 = vadd.f32 %v175_v41, %v134_v40 }
 0x129   :  { %v169_v43 = vpop.f32.mrf.mxu1 }
 0x12a   :  { %v181_v44 = vmax.f32 %v176_v42, 0.0  ;;  %v170_v48 = vadd.f32 %v169_v43, %v124_v45 }
 0x12c   :  { %234 = vmatpush.msra.mxu2 %v181_v44  ;;  %319 = vmatpush.msrb.mxu3 %v181_v44  ;;  %v179_v53 = vmax.f32 %v170_v48, 0.0 }
 0x131   :  { %v172_v47 = vpop.f32.mrf.mxu1 }
 0x132   :  { %v173_v49 = vadd.f32 %v172_v47, %v129_v46 }
 0x134   :  { %v180_v52 = vmax.f32 %v173_v49, 0.0 }
 0x136   :  { %235 = vmatpush.msra.mxu2 %v180_v52  ;;  %320 = vmatpush.msrb.mxu3 %v180_v52 }
 0x138   :  { %236 = vmatpush.msra.mxu2 %v179_v53  ;;  %321 = vmatpush.msrb.mxu3 %v179_v53 }
 0x13a   :  { %237 = vmatpush.msra.mxu2 %v178_v54  ;;  %322 = vmatpush.msrb.mxu3 %v178_v54 }
 0x13b   :  { %310 = vmatmul.msk.f32.vlgmr.msra.gmra.mxu2 %vm136_vm1, %v182_v55  ;;  %313 = vmatmul.msk.f32.vlgmr.msrb.gmra.mxu3 %vm136_vm1, %v185_v56 }
 0x143   :  { %311 = vmatmul.msk.f32.gmra.mxu2 %vm136_vm1, %v183_v57 }
 0x14b   :  { %312 = vmatmul.msk.f32.gmra.mxu2 %vm136_vm1, %v184_v58 }
 0x1be   :  { %v239_v60 = vpop.f32.mrf.mxu2  ;;  %v248_v61 = vpop.f32.mrf.mxu3 }
 0x1bf   :  { %v249_v62 = vadd.f32 %v248_v61, %v208_v59  ;;  %v240_v7 = vadd.f32 %v239_v60, %v193_v6 }
 0x1c1   :  { %v254_v63 = vmax.f32 %v249_v62, 0.0  ;;  %v251_v10 = vmax.f32 %v240_v7, 0.0 }
 0x1c3   :  { %277 = vmatpush.msra.mxu3 %v254_v63 }
 0x1c6   :  { %v242_v0 = vpop.f32.mrf.mxu2 }
 0x1c7   :  { %v243_v4 = vadd.f32 %v242_v0, %v198_v2 }
 0x1c9   :  { %v252_v9 = vmax.f32 %v243_v4, 0.0 }
 0x1ce   :  { %v245_v3 = vpop.f32.mrf.mxu2 }
 0x1cf   :  { %v246_v5 = vadd.f32 %v245_v3, %v203_v1 }
 0x1d1   :  { %v253_v8 = vmax.f32 %v246_v5, 0.0 }
 0x1d3   :  { %278 = vmatpush.msra.mxu3 %v253_v8 }
 0x1d5   :  { %279 = vmatpush.msra.mxu3 %v252_v9 }
 0x1d7   :  { %280 = vmatpush.msra.mxu3 %v251_v10 }
 0x1d8   :  { %314 = vmatmul.msk.f32.vlgmr.msra.gmra.mxu3 %vm136_vm1, %v255_v11 }
 0x25b   :  { %v282_v13 = vpop.f32.mrf.mxu3 }
 0x25c   :  { %v283_v14 = vadd.f32 %v282_v13, %v260_v12 }
 0x25e   :  { %285 = vst [vmem:[#allocation2] sm:$0xf] %v283_v14 }
 0x25f   :  { %296 = dma.vmem_to_hbm [thread:$0]  %s292_s12, 64, %s294_s1, [#allocation3]  }
 0x260   :  { %352 = dma.done.wait [#allocation3], 64  }
 0x261   :  { %353 = vsyncadd [#allocation3], 4294967232 }
 0x262   :  { %301 = vsyncpa [#allocation3], 1 }

</bundles_post_ra>
